<compile_context>
chip_gen: v7x
topology: tpu7x:2x2x1
jax: 0.10.0
libtpu: 0.0.40
codegen_flags: <defaults>
</compile_context>

<pallas_src>
import functools
import math

import numpy as np
import jax
import jax.numpy as jnp
from jax import lax
from jax.experimental import pallas as pl
from jax.experimental.pallas import tpu as pltpu

_VMEM_LIMIT_BYTES = 32 * 1024 * 1024  # safe on v5e/v6e/v7x


# ----------------------------------------------------------------------------
# Tiling helpers
# ----------------------------------------------------------------------------
def _round_up(x, m):
    return ((x + m - 1) // m) * m


def _choose_tile(dim, target, floor):
    """Pick (tile, padded_dim) with tile dividing padded_dim and tile <= ~target."""
    if dim <= floor:
        return dim, dim                      # single full-dim block (always legal)
    if dim <= target:
        if dim % floor == 0:
            return dim, dim
        t = _round_up(dim, floor)
        return t, t                          # pad up to the sublane/lane floor
    t = target
    while t >= max(floor, target // 8):      # prefer an exact divisor near target
        if dim % t == 0:
            return t, dim
        t //= 2
    return target, _round_up(dim, target)    # otherwise pad to a multiple of target


def _pick_seq_tile(slen, target, floor):
    if slen <= target:
        return slen
    t = target
    while t >= floor:
        if slen % t == 0:
            return t
        t //= 2
    # TODO(synk): pad-and-mask awkward sequence lengths instead of full residency.
    return slen


# ----------------------------------------------------------------------------
# Tiled dense matmul kernels (MXU, f32 accumulation)
# ----------------------------------------------------------------------------
def _matmul_kernel_acc(x_ref, w_ref, o_ref, acc_ref):
    @pl.when(pl.program_id(2) == 0)
    def _init():
        acc_ref[...] = jnp.zeros_like(acc_ref)

    acc_ref[...] += jnp.dot(x_ref[...], w_ref[...],
                            preferred_element_type=jnp.float32)

    @pl.when(pl.program_id(2) == pl.num_programs(2) - 1)
    def _finalize():
        o_ref[...] = acc_ref[...].astype(o_ref.dtype)


def _matmul_kernel_noacc(x_ref, w_ref, o_ref):
    # Single K step: no f32 scratch, no zero-init, no extra VMEM store+load.
    o_ref[...] = jnp.dot(x_ref[...], w_ref[...],
                         preferred_element_type=jnp.float32).astype(o_ref.dtype)


def pallas_matmul(x, w, *, out_dtype=jnp.float32, tm=512, tn=512, tk=512):
    """x: (M, K), w: (K, N) -> (M, N), tiled + pipelined. Pads awkward dims."""
    M, K = x.shape
    K2, N = w.shape
    assert K == K2
    sub_floor = 16 if x.dtype == jnp.bfloat16 else 8
    tm, Mp = _choose_tile(M, tm, sub_floor)
    tn, Np = _choose_tile(N, tn, 128)
    tk, Kp = _choose_tile(K, tk, 128)
    if Mp != M or Kp != K:
        x = jnp.pad(x, ((0, Mp - M), (0, Kp - K)))
    if Kp != K or Np != N:
        w = jnp.pad(w, ((0, Kp - K), (0, Np - N)))
    grid = (Mp // tm, Np // tn, Kp // tk)
    single_k = grid[2] == 1
    kernel = _matmul_kernel_noacc if single_k else _matmul_kernel_acc
    scratch = [] if single_k else [pltpu.VMEM((tm, tn), jnp.float32)]
    out = pl.pallas_call(
        kernel,
        out_shape=jax.ShapeDtypeStruct((Mp, Np), out_dtype),
        grid=grid,
        in_specs=[
            pl.BlockSpec((tm, tk), lambda i, j, k: (i, k)),
            pl.BlockSpec((tk, tn), lambda i, j, k: (k, j)),
        ],
        out_specs=pl.BlockSpec((tm, tn), lambda i, j, k: (i, j)),
        scratch_shapes=scratch,
        compiler_params=pltpu.CompilerParams(
            dimension_semantics=("parallel", "parallel", "arbitrary"),
            vmem_limit_bytes=_VMEM_LIMIT_BYTES),
    )(x, w)
    if Mp != M or Np != N:
        out = out[:M, :N]
    return out


# ----------------------------------------------------------------------------
# Fused flash-style attention + output projection kernel
#   grid = (batch, q_tile, kv_tile)   kv last, "arbitrary"
# ----------------------------------------------------------------------------
def _attn_kernel(q_ref, k_ref, v_ref, wout_ref, o_ref, m_ref, l_ref, acc_ref, *,
                 num_head, qk_head_dim, v_head_dim):
    kv_step = pl.program_id(2)

    @pl.when(kv_step == 0)
    def _init():
        m_ref[...] = jnp.full_like(m_ref, -jnp.inf)
        l_ref[...] = jnp.zeros_like(l_ref)
        acc_ref[...] = jnp.zeros_like(acc_ref)

    dot_dtype = q_ref.dtype
    # TODO(synk): put heads (or >=128-wide head groups) on the grid to bound live ranges.
    for h in range(num_head):
        q_sl = slice(h * qk_head_dim, (h + 1) * qk_head_dim)
        v_sl = slice(h * v_head_dim, (h + 1) * v_head_dim)
        m_sl = slice(h, h + 1)
        # 1/sqrt(qk_dim) is pre-folded into the Q columns of the packed weight.
        s = lax.dot_general(q_ref[:, q_sl], k_ref[:, q_sl],
                            (((1,), (1,)), ((), ())),
                            preferred_element_type=jnp.float32)        # (tq, tkv) f32
        m_prev = m_ref[:, m_sl]
        l_prev = l_ref[:, m_sl]
        m_new = jnp.maximum(m_prev, jnp.max(s, axis=-1, keepdims=True))
        alpha = jnp.exp(m_prev - m_new)                                  # (tq, 1)
        p = jnp.exp(s - m_new)                                           # (tq, tkv)
        l_ref[:, m_sl] = alpha * l_prev + jnp.sum(p, axis=-1, keepdims=True)
        m_ref[:, m_sl] = m_new
        acc_ref[:, v_sl] = alpha * acc_ref[:, v_sl] + jnp.dot(
            p.astype(dot_dtype), v_ref[:, v_sl],
            preferred_element_type=jnp.float32)

    @pl.when(kv_step == pl.num_programs(2) - 1)
    def _finalize():
        # Per-head normalization (EUP reciprocal), then fused W_Out projection so the
        # HBM store is one lane-dense (tq, embed_dim) block.
        for h in range(num_head):
            v_sl = slice(h * v_head_dim, (h + 1) * v_head_dim)
            inv_l = pl.reciprocal(l_ref[:, h:h + 1], approx=True)
            acc_ref[:, v_sl] = acc_ref[:, v_sl] * inv_l
        o_ref[...] = jnp.dot(acc_ref[...].astype(dot_dtype), wout_ref[...],
                             preferred_element_type=jnp.float32).astype(o_ref.dtype)


def pallas_attention_fused(proj, w_out_packed, *, num_head, qk_head_dim, v_head_dim,
                           seg, embed_dim, out_dtype=jnp.float32):
    """proj: (B, S, 3*seg) packed [Q|K|V] columns (head-major, each segment padded to
    a multiple of 128). w_out_packed: (seg, embed_dim). Returns (B, S, embed_dim)."""
    bsz, slen, width = proj.shape
    assert width == 3 * seg
    cd = proj.dtype
    sub_floor = 16 if cd == jnp.bfloat16 else 8
    tq = _pick_seq_tile(slen, 256, sub_floor)
    tkv = _pick_seq_tile(slen, 512, sub_floor)
    grid = (bsz, slen // tq, slen // tkv)
    kern = functools.partial(_attn_kernel, num_head=num_head,
                             qk_head_dim=qk_head_dim, v_head_dim=v_head_dim)
    return pl.pallas_call(
        kern,
        out_shape=jax.ShapeDtypeStruct((bsz, slen, embed_dim), out_dtype),
        grid=grid,
        in_specs=[
            # q / k / v are column blocks 0 / 1 / 2 of the SAME projection array:
            pl.BlockSpec((None, tq, seg), lambda b, qi, ki: (b, qi, 0)),
            pl.BlockSpec((None, tkv, seg), lambda b, qi, ki: (b, ki, 1)),
            pl.BlockSpec((None, tkv, seg), lambda b, qi, ki: (b, ki, 2)),
            # W_Out stays resident (constant block index -> fetched once).
            pl.BlockSpec((seg, embed_dim), lambda b, qi, ki: (0, 0)),
        ],
        out_specs=pl.BlockSpec((None, tq, embed_dim), lambda b, qi, ki: (b, qi, 0)),
        scratch_shapes=[
            pltpu.VMEM((tq, num_head), jnp.float32),   # running max per head
            pltpu.VMEM((tq, num_head), jnp.float32),   # running sum per head
            pltpu.VMEM((tq, seg), jnp.float32),        # f32 output accumulator
        ],
        compiler_params=pltpu.CompilerParams(
            dimension_semantics=("parallel", "parallel", "arbitrary"),
            vmem_limit_bytes=_VMEM_LIMIT_BYTES),
    )(proj, proj, proj, w_out_packed)


# ----------------------------------------------------------------------------
# Weight utilities
# ----------------------------------------------------------------------------
def _xavier_uniform(key, shape):
    fan_out, fan_in = shape[0], shape[1]
    limit = math.sqrt(6.0 / (fan_in + fan_out))
    return jax.random.uniform(key, shape, jnp.float32, -limit, limit)


def _deinterleave_columns(w, num_head, head_dim, n_interleave):
    """torch layout col = h*head_dim*n + d*n + s -> list of n matrices, each with
    columns ordered (head, head_dim). One-time weight-only permutation."""
    idx = np.arange(num_head * head_dim * n_interleave).reshape(
        num_head, head_dim, n_interleave)
    return [jnp.take(w, jnp.asarray(idx[:, :, s].reshape(-1)), axis=1)
            for s in range(n_interleave)]


def _pad_cols(w, width):
    pad = width - w.shape[1]
    return w if pad == 0 else jnp.pad(w, ((0, 0), (0, pad)))


# ----------------------------------------------------------------------------
# Module
# ----------------------------------------------------------------------------
class MultiheadedSelfAttentionPallas:
    def __init__(self, num_head, embed_dim, qk_dim=None, v_dim=None,
                 dropout=0.0, *, key, compute_dtype=jnp.bfloat16):
        self.num_head = num_head
        self.embed_dim = embed_dim
        self.qk_dim = qk_dim if qk_dim is not None else embed_dim
        self.v_dim = v_dim if v_dim is not None else embed_dim
        self.uniform_qkv_dim = (
            self.embed_dim == self.qk_dim and self.embed_dim == self.v_dim)
        self.dropout = dropout  # TODO(synk): training-mode dropout not implemented
        self.compute_dtype = compute_dtype

        k1, k2, k3 = jax.random.split(key, 3)
        if self.uniform_qkv_dim:
            self.head_dim = self.embed_dim // self.num_head
            assert self.head_dim * self.num_head == self.embed_dim
            self.qk_head_dim = self.head_dim
            self.v_head_dim = self.head_dim
            # torch-layout weights kept in f32 for the reference check
            self.W_QKV = _xavier_uniform(k1, (self.embed_dim, self.embed_dim * 3))
            wq, wk, wv = _deinterleave_columns(self.W_QKV, self.num_head,
                                               self.head_dim, 3)
        else:
            self.qk_head_dim = self.qk_dim // self.num_head
            self.v_head_dim = self.v_dim // self.num_head
            assert self.qk_head_dim * self.num_head == self.qk_dim
            assert self.v_head_dim * self.num_head == self.v_dim
            self.W_QK = _xavier_uniform(k1, (self.embed_dim, self.qk_dim * 2))
            self.W_V = _xavier_uniform(k2, (self.embed_dim, self.v_dim))
            wq, wk = _deinterleave_columns(self.W_QK, self.num_head,
                                           self.qk_head_dim, 2)
            wv = self.W_V  # torch V layout is already head-major (h*v_head_dim + d)
        self.W_Out = _xavier_uniform(k3, (self.v_dim, self.embed_dim))

        # ---- packed kernel weights ----
        # Each of Q / K / V occupies one `seg`-wide column segment (multiple of 128)
        # so the attention BlockSpecs can address them as column blocks 0/1/2.
        self.seg = _round_up(max(self.qk_dim, self.v_dim), 128)
        scale = 1.0 / math.sqrt(self.qk_dim)  # full qk_dim, as in the torch code
        self.W_proj_packed = jnp.concatenate(
            [_pad_cols(wq * scale, self.seg),
             _pad_cols(wk, self.seg),
             _pad_cols(wv, self.seg)], axis=1).astype(compute_dtype)  # (E, 3*seg)
        wout = self.W_Out
        if self.seg != self.v_dim:
            wout = jnp.pad(wout, ((0, self.seg - self.v_dim), (0, 0)))
        self.W_Out_packed = wout.astype(compute_dtype)                # (seg, E)

    def __call__(self, x):
        bsz, slen, embed_dim = x.shape
        cd = self.compute_dtype
        x2d = x.reshape(bsz * slen, embed_dim).astype(cd)
        # one fused projection matmul (q, k, v all at once), no slice copies after it
        proj = pallas_matmul(x2d, self.W_proj_packed, out_dtype=cd)   # (B*S, 3*seg)
        proj = proj.reshape(bsz, slen, 3 * self.seg)                  # free reshape
        out = pallas_attention_fused(
            proj, self.W_Out_packed, num_head=self.num_head,
            qk_head_dim=self.qk_head_dim, v_head_dim=self.v_head_dim,
            seg=self.seg, embed_dim=embed_dim, out_dtype=jnp.float32)
        return out                                                     # (B, S, E)


# ----------------------------------------------------------------------------
# Pure-JAX reference (mirrors the torch forward exactly) for validation
# ----------------------------------------------------------------------------
def reference_forward(mod, x):
    bsz, slen, embed_dim = x.shape
    if mod.uniform_qkv_dim:
        qkv = (x @ mod.W_QKV).reshape(bsz, slen, mod.num_head, mod.head_dim, 3)
        qkv = jnp.transpose(qkv, (0, 2, 1, 3, 4))
        q, k, v = qkv[..., 0], qkv[..., 1], qkv[..., 2]
    else:
        qk = (x @ mod.W_QK).reshape(bsz, slen, mod.num_head, mod.qk_head_dim, 2)
        qk = jnp.transpose(qk, (0, 2, 1, 3, 4))
        q, k = qk[..., 0], qk[..., 1]
        v = (x @ mod.W_V).reshape(bsz, slen, mod.num_head, mod.v_head_dim)
        v = jnp.transpose(v, (0, 2, 1, 3))
    attn = jax.nn.softmax(
        jnp.einsum("bhqd,bhkd->bhqk", q, k) / math.sqrt(mod.qk_dim), axis=-1)
    out = jnp.einsum("bhqk,bhkd->bhqd", attn, v)
    out = jnp.transpose(out, (0, 2, 1, 3)).reshape(bsz, slen, mod.v_dim)
    return out @ mod.W_Out


if __name__ == "__main__":
    key = jax.random.PRNGKey(0)
    k_p1, k_p2, k_x = jax.random.split(key, 3)

    bsz, slen, embed_dim, num_head = 2, 8, 32, 4
    x = jax.random.normal(k_x, (bsz, slen, embed_dim), jnp.float32)

    # 1) uniform qkv dims, f32 compute -> tight check vs pure-JAX reference
    mod_f32 = MultiheadedSelfAttentionPallas(
        num_head, embed_dim, key=k_p1, compute_dtype=jnp.float32)
    out_f32 = jax.block_until_ready(mod_f32(x))
    ref = reference_forward(mod_f32, x)
    assert out_f32.shape == (bsz, slen, embed_dim)
    assert jnp.allclose(out_f32, ref, atol=1e-2, rtol=1e-2), "f32 mismatch vs reference"

    # 2) same weights, bf16 compute (f32 accumulation) -> looser tolerance
    mod_bf16 = MultiheadedSelfAttentionPallas(
        num_head, embed_dim, key=k_p1, compute_dtype=jnp.bfloat16)
    out_bf16 = jax.block_until_ready(mod_bf16(x))
    assert jnp.allclose(out_bf16, ref, atol=1e-1, rtol=1e-1), "bf16 mismatch vs reference"

    # 3) non-uniform qk/v dims branch, f32 compute
    mod_nu = MultiheadedSelfAttentionPallas(
        num_head, embed_dim, qk_dim=16, v_dim=64, key=k_p2,
        compute_dtype=jnp.float32)
    out_nu = jax.block_until_ready(mod_nu(x))
    ref_nu = reference_forward(mod_nu, x)
    assert out_nu.shape == (bsz, slen, embed_dim)
    assert jnp.allclose(out_nu, ref_nu, atol=1e-2, rtol=1e-2), "non-uniform mismatch"

    print("KERNEL_OK")
</pallas_src>

<mosaic_0001>
module attributes {stable_mosaic.version = 11 : i64} {
  func.func @_matmul_kernel_noacc(%arg0: i32, %arg1: i32, %arg2: i32, %arg3: memref<16x32xf32, #tpu.memory_space<vmem>>, %arg4: memref<32x384xf32, #tpu.memory_space<vmem>>, %arg5: memref<16x384xf32, #tpu.memory_space<vmem>>) attributes {dimension_semantics = [#tpu.dimension_semantics<parallel>, #tpu.dimension_semantics<parallel>, #tpu.dimension_semantics<arbitrary>], iteration_bounds = array<i64: 1, 1, 1>, scalar_prefetch = 0 : i64, scratch_operands = 0 : i64, tpu.core_type = #tpu.core_type<tc>, window_params = [{transform_indices = @transform_0, window_bounds = array<i64: 16, 32>}, {transform_indices = @transform_1, window_bounds = array<i64: 32, 384>}, {transform_indices = @transform_2, window_bounds = array<i64: 16, 384>}]} {
    %c0 = arith.constant 0 : index
    %c0_0 = arith.constant 0 : index
    %0 = vector.load %arg3[%c0, %c0_0] : memref<16x32xf32, #tpu.memory_space<vmem>>, vector<16x32xf32>
    %c0_1 = arith.constant 0 : index
    %c0_2 = arith.constant 0 : index
    %1 = vector.load %arg4[%c0_1, %c0_2] : memref<32x384xf32, #tpu.memory_space<vmem>>, vector<32x384xf32>
    %cst = arith.constant dense<0.000000e+00> : vector<16x384xf32>
    %2 = tpu.matmul %0, %1, %cst {dimension_numbers = #tpu.dot_dimension_numbers<[1], [0], [0], [1], [0, 0, 1, 1], [], []>} : vector<16x32xf32>, vector<32x384xf32>, vector<16x384xf32> -> vector<16x384xf32>
    %c0_3 = arith.constant 0 : index
    %c0_4 = arith.constant 0 : index
    %3 = vector.load %arg5[%c0_3, %c0_4] : memref<16x384xf32, #tpu.memory_space<vmem>>, vector<16x384xf32>
    tpu.vector_store %arg5[%c0_3, %c0_4], %2 {strides = array<i32>} : memref<16x384xf32, #tpu.memory_space<vmem>>, vector<16x384xf32>,
    return
  }
  func.func @transform_0(%arg0: i32, %arg1: i32, %arg2: i32) -> (i32, i32) {
    %c0_i32 = arith.constant 0 : i32
    return %arg0, %arg2 : i32, i32
  }
  func.func @transform_1(%arg0: i32, %arg1: i32, %arg2: i32) -> (i32, i32) {
    %c0_i32 = arith.constant 0 : i32
    return %arg2, %arg1 : i32, i32
  }
  func.func @transform_2(%arg0: i32, %arg1: i32, %arg2: i32) -> (i32, i32) {
    %c0_i32 = arith.constant 0 : i32
    return %arg0, %arg1 : i32, i32
  }
}

</mosaic_0001>

<bundles_post_ra>
// kernel: tpu_custom_call.1
= control target key start
LH: loop header
LB: loop body
LE: loop exit
PB: predicated region body
PF: predicated region fallthrough
CT: control target
= control target key end

     0   :  { %7 = vsyncpa [#allocation3], 0  ;;  %s419_s0 = inlined_call_operand.hbm [shape: f32[16,32], index: 0, kind: input, shape index: {}]   ;;  %s420_s1 = inlined_call_operand.hbm [shape: f32[32,384], index: 1, kind: input, shape index: {}]   ;;  %s421_s2 = inlined_call_operand.hbm [shape: f32[16,384], index: 2, kind: output, shape index: {}]  }
   0x1   :  { %8 = vsyncpa [#allocation6], 0 }
   0x2   :  { %9 = vsyncpa [#allocation4], 0  ;;  %s354_s9 = smov [#allocation2]   ;;  %s282_s13 = scalar_lea.hbm %s419_s0, 256 }
   0x3   :  { %s15_s10 = sshll.u32 %s354_s9, 4  ;;  %p283_p0 = scmp.ne.s32.totalorder %s419_s0, %s282_s13  ;;  %s16_s10 = int_to_ptr.vmem [resolvable:$true] %s15_s10 }
   0x4   :  { %p286_p1 = scmp.lt.u32.totalorder %s282_s13, %s419_s0 }
   0x6   :  { %p288_p2 = pnand %p286_p1, %p283_p0 }
   0x8   :  { %291 = shalt.err (!%p288_p2)
}
   0x9   :  { %s292_s18 = scalar_lea.vmem %s16_s10, 256  ;;  %p297_p4 = scmp.lt.s32.totalorder %s16_s10, %s16_s10 }
   0xa   :  { %p293_p3 = scmp.ne.s32.totalorder %s16_s10, %s292_s18  ;;  %p298_p5 = scmp.lt.s32.totalorder %s292_s18, %s292_s18 }
   0xc   :  { %p299_p6 = por %p298_p5, %p297_p4 }
   0xe   :  { %p300_p7 = pnand %p299_p6, %p293_p3 }
  0x10   :  { %303 = shalt.err (!%p300_p7)
}
  0x11   :  { %s355_s19 = smov 128   ;;  %s356_s20 = smov 8  }
  0x12   :  { %21 = dma.hbm_to_vmem [thread:$0]  %s419_s0, 256, %s16_s10, [#allocation3], %s355_s19, %s355_s19, %s356_s20  }
  0x13   :  { %s357_s23 = smov [#allocation5]   ;;  %s304_s27 = scalar_lea.hbm %s420_s1, 1536 }
  0x14   :  { %s27_s24 = sshll.u32 %s357_s23, 4  ;;  %p305_p8 = scmp.ne.s32.totalorder %s420_s1, %s304_s27  ;;  %s28_s24 = int_to_ptr.vmem [resolvable:$true] %s27_s24 }
  0x15   :  { %p308_p9 = scmp.lt.u32.totalorder %s304_s27, %s420_s1 }
  0x17   :  { %p310_p10 = pnand %p308_p9, %p305_p8 }
  0x19   :  { %313 = shalt.err (!%p310_p10)
}
  0x1a   :  { %s314_s4 = scalar_lea.vmem %s28_s24, 1536  ;;  %p319_p12 = scmp.lt.s32.totalorder %s28_s24, %s28_s24 }
  0x1b   :  { %p315_p11 = scmp.ne.s32.totalorder %s28_s24, %s314_s4  ;;  %p320_p13 = scmp.lt.s32.totalorder %s314_s4, %s314_s4 }
  0x1d   :  { %p321_p0 = por %p320_p13, %p319_p12 }
  0x1f   :  { %p322_p1 = pnand %p321_p0, %p315_p11 }
  0x21   :  { %325 = shalt.err (!%p322_p1)
}
  0x22   :  { %s358_s0 = smov 384   ;;  %s359_s5 = smov 24  }
  0x23   :  { %33 = dma.hbm_to_vmem [thread:$0]  %s420_s1, 1536, %s28_s24, [#allocation6], %s358_s0, %s358_s0, %s359_s5  }
  0x24   :  { %348 = dma.done.wait [#allocation3], 256  }
  0x25   :  { %349 = vsyncadd [#allocation3], 4294967040 }
  0x26   :  { %350 = dma.done.wait [#allocation6], 1536  }
  0x27   :  { %351 = vsyncadd [#allocation6], 4294965760  ;;  %v360_v0 = vmov 0.0   ;;  %v43_v1 = vld [vmem:[#allocation5 + $0x8] sm:$0xff]  ;;  %v46_v2 = vld [vmem:[#allocation5 + $0x20] sm:$0xff]  ;;  %vm54_vm0 = vcmask 261120  }
  0x28   :  { %125 = vmatprep.mubr.f32.mxu0 %v360_v0  ;;  %v42_v3 = vld [vmem:[#allocation5] sm:$0xff]  ;;  %v258_v4 = vpack.c.bf16 %v46_v2, %v43_v1  ;;  %v45_v5 = vld [vmem:[#allocation5 + $0x18] sm:$0xff]  ;;  %v44_v6 = vld [vmem:[#allocation5 + $0x10] sm:$0xff]  ;;  %s361_s1 = smov [#allocation7]  }
  0x29   :  { %v47_v7 = vld [vmem:[#allocation5 + $0x28] sm:$0xff]  ;;  %v260_v8 = vpack.c.bf16 %v45_v5, %v42_v3  ;;  %v49_v10 = vld [vmem:[#allocation5 + $0x38] sm:$0xff]  ;;  %v52_v11 = vld [vmem:[#allocation5 + $0x50] sm:$0xff]  ;;  %s224_s8 = sshll.u32 %s361_s1, 4  ;;  %s225_s8 = int_to_ptr.vmem [resolvable:$true] %s224_s8 }
  0x2a   :  { %v266_v9 = vpack.c.bf16 %v47_v7, %v44_v6  ;;  %v48_v12 = vld [vmem:[#allocation5 + $0x30] sm:$0xff]  ;;  %259 = vmatprep.subr.bf16.mxu0 %v258_v4  ;;  %v262_v13 = vpack.c.bf16 %v52_v11, %v49_v10  ;;  %v51_v14 = vld [vmem:[#allocation5 + $0x48] sm:$0xff]  ;;  %v50_v15 = vld [vmem:[#allocation5 + $0x40] sm:$0xff]  ;;  %s326_s9 = scalar_lea.vmem %s225_s8, 768  ;;  %p331_p3 = scmp.lt.s32.totalorder %s225_s8, %s225_s8 }
  0x2b   :  { %v53_v16 = vld [vmem:[#allocation5 + $0x58] sm:$0xff]  ;;  %261 = vmatpush1.bf16.msra.mxu0 %v260_v8  ;;  %v264_v17 = vpack.c.bf16 %v51_v14, %v48_v12  ;;  %v40_v19 = vld [vmem:[#allocation2] sm:$0xff]  ;;  %p327_p2 = scmp.ne.s32.totalorder %s225_s8, %s326_s9  ;;  %p332_p4 = scmp.lt.s32.totalorder %s326_s9, %s326_s9 }
  0x2c   :  { %267 = vmatprep.subr.bf16.mxu1 %v266_v9  ;;  %v270_v18 = vpack.c.bf16 %v53_v16, %v50_v15  ;;  %263 = vmatprep.subr.bf16.mxu0 %v262_v13  ;;  %v41_v20 = vld [vmem:[#allocation2 + $0x8] sm:$0xff] }
  0x2d   :  { %269 = vmatpush3.bf16.msra.mxu1 %v266_v9  ;;  %255 = vmatprep.mubr.msk.f32.mxu1 %vm54_vm0, %v40_v19  ;;  %p333_p5 = por %p332_p4, %p331_p3 }
  0x2e   :  { %271 = vmatprep.subr.bf16.mxu1 %v270_v18 }
  0x2f   :  { %265 = vmatpush1.bf16.msra.mxu0 %v264_v17  ;;  %p334_p6 = pnand %p333_p5, %p327_p2 }
  0x31   :  { %273 = vmatpush3.bf16.msra.mxu1 %v270_v18 }
  0x32   :  { %237 = vmatmul.mubr.msk.f32.vlgmr.msra.gmra.mrb[0].mxu0 %vm54_vm0, %v40_v19 }
  0x33   :  { %131 = vmatprep.mubr.f32.mxu0 %v360_v0 }
  0x34   :  { %256 = vmatmul.mubr.msk.f32.vlgmr.msra.gmra.mrb[0].mxu1 %vm54_vm0, %v41_v20 }
  0x36   :  { %238 = vmatmul.mubr.msk.f32.gmra.mrb[2].mxu0 %vm54_vm0, %v41_v20 }
 0x105   :  { %v127_v21 = vpop.f32.mrb[0].mxu0 }
 0x106   :  { %213 = vst [vmem:[#allocation7] sm:$0xff] %v127_v21  ;;  %v129_v22 = vpop.f32.mrb[1].mxu0 }
 0x107   :  { %v257_v23 = vpop.f32.mrb[0].mxu1  ;;  %214 = vst [vmem:[#allocation7 + $0x8] sm:$0xff] %v129_v22 }
 0x108   :  { %218 = vst [vmem:[#allocation7 + $0x28] sm:$0xff] %v257_v23  ;;  %v204_v24 = vpop.f32.mrb[1].mxu1 }
 0x109   :  { %215 = vst [vmem:[#allocation7 + $0x10] sm:$0xff] %v204_v24  ;;  %v133_v25 = vpop.f32.mrb[2].mxu0 }
 0x10a   :  { %216 = vst [vmem:[#allocation7 + $0x18] sm:$0xff] %v133_v25  ;;  %v135_v26 = vpop.f32.mrb[3].mxu0 }
 0x10b   :  { %217 = vst [vmem:[#allocation7 + $0x20] sm:$0xff] %v135_v26 }
 0x10c   :  { %337 = shalt.err (!%p334_p6)
}
 0x10d   :  { %s338_s12 = scalar_lea.hbm %s421_s2, 768 }
 0x10e   :  { %p339_p7 = scmp.ne.s32.totalorder %s421_s2, %s338_s12  ;;  %p342_p8 = scmp.lt.u32.totalorder %s338_s12, %s421_s2 }
 0x110   :  { %p344_p9 = pnand %p342_p8, %p339_p7 }
 0x112   :  { %347 = shalt.err (!%p344_p9)
}
 0x113   :  { %230 = dma.vmem_to_hbm [thread:$0]  %s225_s8, 768, %s421_s2, [#allocation4], %s358_s0, %s358_s0, %s359_s5  }
 0x114   :  { %352 = dma.done.wait [#allocation4], 768  }
 0x115   :  { %353 = vsyncadd [#allocation4], 4294966528 }
 0x116   :  { %234 = vsyncpa [#allocation3], 1 }
 0x117   :  { %235 = vsyncpa [#allocation6], 1 }
 0x118   :  { %236 = vsyncpa [#allocation4], 1 }

</bundles_post_ra>
